<compile_context>
chip_gen: v7x
topology: tpu7x:2x2x1
jax: 0.10.0
libtpu: 0.0.40
codegen_flags: <defaults>
</compile_context>

<pallas_src>
import functools

import jax
import jax.numpy as jnp
from jax.experimental import pallas as pl
from jax.experimental.pallas import tpu as pltpu


def _round_up(x, m):
    return ((x + m - 1) // m) * m


def _pick_batch_tile(batch, hidden, target_rows=256):
    """Largest divisor of `batch` with batch_tile * hidden <= target_rows (>= 1)."""
    limit = max(1, target_rows // hidden)
    bt = 1
    for cand in range(1, min(batch, limit) + 1):
        if batch % cand == 0:
            bt = cand
    return bt


def _layer_kernel(x_ref, edge_ref, wc_ref, bc_ref, wl_t_ref, bl_ref,
                  wcomp_t_ref, bcomp_ref, vec_out_ref, com_out_ref,
                  *, b_tile, hidden, length, lane_pad, matmul_dtype):
    BT, H, L, LP = b_tile, hidden, length, lane_pad
    n_cl = BT * L

    x = x_ref[...]                                   # (BT*H, L) f32, rows = (b, channel)

    # ---- conv layout: batch elements side-by-side along lanes -> (H, BT*L) ----
    if BT > 1:
        x_cl = jnp.concatenate([x[b * H:(b + 1) * H, :] for b in range(BT)], axis=1)
    else:
        x_cl = x
    edge = edge_ref[...]                             # (2, BT*L): [not_first, not_last]
    not_first = edge[0:1, :]
    not_last = edge[1:2, :]
    # shifted conv windows via XLU roll; per-position masks stop cross-batch leakage
    x_prev = pltpu.roll(x_cl, shift=1, axis=1) * not_first           # x[:, l-1]
    x_next = pltpu.roll(x_cl, shift=n_cl - 1, axis=1) * not_last     # x[:, l+1]
    stacked = jnp.concatenate([x_prev, x_cl, x_next], axis=0).astype(matmul_dtype)  # (3H, BT*L)

    # ---- Conv1d(H, H, k=3, pad=1): ONE (H,3H) @ (3H, BT*L) MXU dot ----
    conv_cl = jnp.dot(wc_ref[...], stacked, preferred_element_type=jnp.float32)
    conv_cl = conv_cl + bc_ref[...]                  # (H, BT*L) + (H, 1)

    # ---- back to row layout (BT*H, L): rotate each batch's lanes to the front ----
    pieces = []
    for b in range(BT):
        blk = conv_cl if b == 0 else pltpu.roll(conv_cl, shift=n_cl - b * L, axis=1)
        pieces.append(blk[:, :L])
    conv_rows = jnp.concatenate(pieces, axis=0) if BT > 1 else pieces[0]   # (BT*H, L)

    # ---- Linear(H, H) over the last dim: ONE (BT*H, L) @ (L, H) dot ----
    lin = jnp.dot(x.astype(matmul_dtype), wl_t_ref[...],
                  preferred_element_type=jnp.float32)
    lin = lin + bl_ref[...]                          # (BT*H, H) + (1, H)

    # ---- residual + relu combine (f32 on the VPU) ----
    vec_new = x + jnp.maximum(conv_rows, 0.0) + jnp.maximum(lin, 0.0)      # (BT*H, L)

    # ---- comp: Linear(H, percom) on the combined vec (lane-padded weights) ----
    com = jnp.dot(vec_new.astype(matmul_dtype), wcomp_t_ref[...],
                  preferred_element_type=jnp.float32)
    com = com + bcomp_ref[...]                       # (BT*H, P_pad)

    # ---- lane-dense stores (last dim multiple of 128 -> unmasked vst) ----
    if LP > L:
        vec_new = jnp.concatenate(
            [vec_new, jnp.zeros((BT * H, LP - L), vec_new.dtype)], axis=1)
    vec_out_ref[...] = vec_new.astype(vec_out_ref.dtype)
    com_out_ref[...] = com.astype(com_out_ref.dtype)


def layer_forward(vec, wc, bc, wl, bl, wcomp, bcomp, *, matmul_dtype=jnp.bfloat16):
    """vec: (B, H, L=H) f32.  wc: Conv1d weight (H, H, 3).  wl: (H, H).  wcomp: (P, H).

    Returns (vec_new, com) matching the PyTorch module forward.

    Precision contract: MXU operands are cast to `matmul_dtype` (default bf16 —
    the native MXU dtype on v5e/v6e/v7x) with f32 accumulation; residual adds,
    biases and relu stay f32.  Pass matmul_dtype=jnp.float32 for tight parity
    with the fp32 PyTorch reference (debug path; multi-pass on the MXU).
    """
    B, H, L = vec.shape
    assert L == H, "nn.Linear(hidden, hidden) on last dim requires L == hidden_dim"
    assert H % 8 == 0, "hidden_dim must be a multiple of 8 (sublane tiling)"
    P = wcomp.shape[0]

    B_TILE = _pick_batch_tile(B, H)          # M ~ 256 rows per dot (v6e/v7x MXU)
    LP = _round_up(L, 128)                   # lane-dense vec output width
    PP = _round_up(P, 128)                   # lane-dense com output width

    # Tiny one-time weight reshapes, done in XLA outside the kernel:
    #   wc_flat[o, k*H + i] = wc[o, i, k]  -> conv becomes one (H,3H)x(3H,.) dot.
    wc_flat = jnp.transpose(wc, (0, 2, 1)).reshape(H, 3 * H).astype(matmul_dtype)
    bc2 = bc.reshape(H, 1).astype(jnp.float32)
    wl_t = wl.T.astype(matmul_dtype)                                      # (L, H)
    bl2 = bl.reshape(1, H).astype(jnp.float32)
    wcomp_t = jnp.pad(wcomp.T, ((0, 0), (0, PP - P))).astype(matmul_dtype)  # (L, PP)
    bcomp2 = jnp.pad(bcomp.reshape(1, P), ((0, 0), (0, PP - P))).astype(jnp.float32)

    # Conv boundary masks (per lane position within a batch element), computed once.
    pos = jnp.arange(B_TILE * L, dtype=jnp.int32) % L
    edge = jnp.stack([pos != 0, pos != L - 1], axis=0).astype(jnp.float32)  # (2, BT*L)

    vec2 = vec.reshape(B * H, L)             # free contiguous reshape (row layout)
    const = lambda i: (0, 0)

    kernel = functools.partial(
        _layer_kernel, b_tile=B_TILE, hidden=H, length=L, lane_pad=LP,
        matmul_dtype=matmul_dtype)

    # TODO(synk): for H >= 1024, tile the (H, 3H)/(H, H) weights along output
    # rows, mark the constant-index weight specs pipeline_mode=pl.Buffered(1),
    # and set vmem_limit_bytes explicitly (v7x only has 64 MiB VMEM).
    vec_out, com_out = pl.pallas_call(
        kernel,
        out_shape=(
            jax.ShapeDtypeStruct((B * H, LP), vec.dtype),
            jax.ShapeDtypeStruct((B * H, PP), vec.dtype),
        ),
        grid_spec=pltpu.PrefetchScalarGridSpec(
            num_scalar_prefetch=0,
            grid=(B // B_TILE,),             # few fat steps; "parallel" for v7x 2 TCs
            in_specs=[
                pl.BlockSpec((B_TILE * H, L), lambda i: (i, 0)),   # activations
                pl.BlockSpec((2, B_TILE * L), const),              # boundary masks
                pl.BlockSpec((H, 3 * H), const),                   # fused conv weight
                pl.BlockSpec((H, 1), const),                       # conv bias
                pl.BlockSpec((H, H), const),                       # linear weight^T
                pl.BlockSpec((1, H), const),                       # linear bias
                pl.BlockSpec((H, PP), const),                      # comp weight^T (lane-padded)
                pl.BlockSpec((1, PP), const),                      # comp bias (lane-padded)
            ],
            out_specs=[
                pl.BlockSpec((B_TILE * H, LP), lambda i: (i, 0)),
                pl.BlockSpec((B_TILE * H, PP), lambda i: (i, 0)),
            ],
        ),
        compiler_params=pltpu.CompilerParams(
            dimension_semantics=("parallel",)),
    )(vec2, edge, wc_flat, bc2, wl_t, bl2, wcomp_t, bcomp2)

    vec_new = vec_out[:, :L].reshape(B, H, L)
    com = com_out[:, :P].reshape(B, H, P)
    return vec_new, com


def _reference(vec, wc, bc, wl, bl, wcomp, bcomp):
    """Pure-JAX reference mirroring the PyTorch forward (f32 everywhere)."""
    B, H, L = vec.shape
    xpad = jnp.pad(vec, ((0, 0), (0, 0), (1, 1)))
    conv = jnp.zeros((B, H, L), jnp.float32)
    for k in range(3):
        conv = conv + jnp.einsum("oi,bil->bol", wc[:, :, k], xpad[:, :, k:k + L])
    conv = conv + bc[None, :, None]
    lin = jnp.einsum("bil,jl->bij", vec, wl) + bl[None, None, :]
    v = vec + jnp.maximum(conv, 0.0) + jnp.maximum(lin, 0.0)
    com = jnp.einsum("bil,jl->bij", v, wcomp) + bcomp[None, None, :]
    return v, com


if __name__ == "__main__":
    B, H, P = 2, 32, 8   # batch, hidden_dim, percom ; seq length == hidden_dim

    key = jax.random.PRNGKey(0)
    kx, kwc, kbc, kwl, kbl, kwp, kbp = jax.random.split(key, 7)

    vec = jax.random.normal(kx, (B, H, H), jnp.float32)
    wc = jax.random.normal(kwc, (H, H, 3), jnp.float32) * 0.1      # Conv1d weight (O, I, K)
    bc = jax.random.normal(kbc, (H,), jnp.float32) * 0.1
    wl = jax.random.normal(kwl, (H, H), jnp.float32) * 0.1         # Linear(H, H) (out, in)
    bl = jax.random.normal(kbl, (H,), jnp.float32) * 0.1
    wcomp = jax.random.normal(kwp, (P, H), jnp.float32) * 0.1      # Linear(H, P) (out, in)
    bcomp = jax.random.normal(kbp, (P,), jnp.float32) * 0.1

    vec_ref, com_ref = _reference(vec, wc, bc, wl, bl, wcomp, bcomp)

    # Exact-semantics path: fp32 MXU operands, tight tolerance.
    v32, c32 = layer_forward(vec, wc, bc, wl, bl, wcomp, bcomp,
                             matmul_dtype=jnp.float32)
    jax.block_until_ready((v32, c32))
    assert jnp.allclose(v32, vec_ref, atol=1e-4, rtol=1e-4)
    assert jnp.allclose(c32, com_ref, atol=1e-4, rtol=1e-4)

    # Default perf path: bf16 MXU operands with f32 accumulation (MXU-native).
    vbf, cbf = layer_forward(vec, wc, bc, wl, bl, wcomp, bcomp,
                             matmul_dtype=jnp.bfloat16)
    jax.block_until_ready((vbf, cbf))
    assert jnp.allclose(vbf, vec_ref, atol=1e-1, rtol=1e-1)
    assert jnp.allclose(cbf, com_ref, atol=1e-1, rtol=1e-1)

    print("KERNEL_OK")
</pallas_src>

<mosaic_0001>
module attributes {stable_mosaic.version = 11 : i64} {
  func.func @_layer_kernel(%arg0: i32, %arg1: memref<64x32xf32, #tpu.memory_space<vmem>>, %arg2: memref<2x64xf32, #tpu.memory_space<vmem>>, %arg3: memref<32x96xf32, #tpu.memory_space<vmem>>, %arg4: memref<32x1xf32, #tpu.memory_space<vmem>>, %arg5: memref<32x32xf32, #tpu.memory_space<vmem>>, %arg6: memref<1x32xf32, #tpu.memory_space<vmem>>, %arg7: memref<32x128xf32, #tpu.memory_space<vmem>>, %arg8: memref<1x128xf32, #tpu.memory_space<vmem>>, %arg9: memref<64x128xf32, #tpu.memory_space<vmem>>, %arg10: memref<64x128xf32, #tpu.memory_space<vmem>>) attributes {dimension_semantics = [#tpu.dimension_semantics<parallel>], iteration_bounds = array<i64: 1>, scalar_prefetch = 0 : i64, scratch_operands = 0 : i64, tpu.core_type = #tpu.core_type<tc>, window_params = [{transform_indices = @transform_0, window_bounds = array<i64: 64, 32>}, {pipeline_mode = #tpu.pipeline_mode<synchronous>, transform_indices = @transform_1, window_bounds = array<i64: 2, 64>}, {pipeline_mode = #tpu.pipeline_mode<synchronous>, transform_indices = @transform_2, window_bounds = array<i64: 32, 96>}, {pipeline_mode = #tpu.pipeline_mode<synchronous>, transform_indices = @transform_3, window_bounds = array<i64: 32, 1>}, {pipeline_mode = #tpu.pipeline_mode<synchronous>, transform_indices = @transform_4, window_bounds = array<i64: 32, 32>}, {pipeline_mode = #tpu.pipeline_mode<synchronous>, transform_indices = @transform_5, window_bounds = array<i64: 1, 32>}, {pipeline_mode = #tpu.pipeline_mode<synchronous>, transform_indices = @transform_6, window_bounds = array<i64: 32, 128>}, {pipeline_mode = #tpu.pipeline_mode<synchronous>, transform_indices = @transform_7, window_bounds = array<i64: 1, 128>}, {transform_indices = @transform_8, window_bounds = array<i64: 64, 128>}, {transform_indices = @transform_9, window_bounds = array<i64: 64, 128>}]} {
    %c0 = arith.constant 0 : index
    %c0_0 = arith.constant 0 : index
    %0 = vector.load %arg1[%c0, %c0_0] : memref<64x32xf32, #tpu.memory_space<vmem>>, vector<64x32xf32>
    %1 = vector.extract_strided_slice %0 {offsets = [0, 0], sizes = [32, 32], strides = [1, 1]} : vector<64x32xf32> to vector<32x32xf32>
    %2 = vector.extract_strided_slice %0 {offsets = [32, 0], sizes = [32, 32], strides = [1, 1]} : vector<64x32xf32> to vector<32x32xf32>
    %3 = tpu.concatenate %1, %2 in 1 : vector<32x32xf32>, vector<32x32xf32> -> vector<32x64xf32>
    %c0_1 = arith.constant 0 : index
    %c0_2 = arith.constant 0 : index
    %4 = vector.load %arg2[%c0_1, %c0_2] : memref<2x64xf32, #tpu.memory_space<vmem>>, vector<2x64xf32>
    %5 = vector.extract_strided_slice %4 {offsets = [0, 0], sizes = [1, 64], strides = [1, 1]} : vector<2x64xf32> to vector<1x64xf32>
    %6 = vector.extract_strided_slice %4 {offsets = [1, 0], sizes = [1, 64], strides = [1, 1]} : vector<2x64xf32> to vector<1x64xf32>
    %c1_i32 = arith.constant 1 : i32
    %7 = tpu.dynamic_rotate %3 by %c1_i32 dim 1 : vector<32x64xf32>, i32 -> vector<32x64xf32>
    %8 = vector.broadcast %5 : vector<1x64xf32> to vector<32x64xf32>
    %9 = arith.mulf %7, %8 : vector<32x64xf32>
    %c63_i32 = arith.constant 63 : i32
    %10 = tpu.dynamic_rotate %3 by %c63_i32 dim 1 : vector<32x64xf32>, i32 -> vector<32x64xf32>
    %11 = vector.broadcast %6 : vector<1x64xf32> to vector<32x64xf32>
    %12 = arith.mulf %10, %11 : vector<32x64xf32>
    %13 = tpu.concatenate %9, %3, %12 in 0 : vector<32x64xf32>, vector<32x64xf32>, vector<32x64xf32> -> vector<96x64xf32>
    %c0_3 = arith.constant 0 : index
    %c0_4 = arith.constant 0 : index
    %14 = vector.load %arg3[%c0_3, %c0_4] : memref<32x96xf32, #tpu.memory_space<vmem>>, vector<32x96xf32>
    %cst = arith.constant dense<0.000000e+00> : vector<32x64xf32>
    %15 = tpu.matmul %14, %13, %cst {dimension_numbers = #tpu.dot_dimension_numbers<[1], [0], [0], [1], [0, 0, 1, 1], [], []>} : vector<32x96xf32>, vector<96x64xf32>, vector<32x64xf32> -> vector<32x64xf32>
    %c0_5 = arith.constant 0 : index
    %c0_6 = arith.constant 0 : index
    %16 = vector.load %arg4[%c0_5, %c0_6] : memref<32x1xf32, #tpu.memory_space<vmem>>, vector<32x1xf32>
    %17 = vector.broadcast %16 : vector<32x1xf32> to vector<32x64xf32>
    %18 = arith.addf %15, %17 : vector<32x64xf32>
    %19 = vector.extract_strided_slice %18 {offsets = [0, 0], sizes = [32, 32], strides = [1, 1]} : vector<32x64xf32> to vector<32x32xf32>
    %c32_i32 = arith.constant 32 : i32
    %20 = tpu.dynamic_rotate %18 by %c32_i32 dim 1 : vector<32x64xf32>, i32 -> vector<32x64xf32>
    %21 = vector.extract_strided_slice %20 {offsets = [0, 0], sizes = [32, 32], strides = [1, 1]} : vector<32x64xf32> to vector<32x32xf32>
    %22 = tpu.concatenate %19, %21 in 0 : vector<32x32xf32>, vector<32x32xf32> -> vector<64x32xf32>
    %c0_7 = arith.constant 0 : index
    %c0_8 = arith.constant 0 : index
    %23 = vector.load %arg5[%c0_7, %c0_8] : memref<32x32xf32, #tpu.memory_space<vmem>>, vector<32x32xf32>
    %cst_9 = arith.constant dense<0.000000e+00> : vector<64x32xf32>
    %24 = tpu.matmul %0, %23, %cst_9 {dimension_numbers = #tpu.dot_dimension_numbers<[1], [0], [0], [1], [0, 0, 1, 1], [], []>} : vector<64x32xf32>, vector<32x32xf32>, vector<64x32xf32> -> vector<64x32xf32>
    %c0_10 = arith.constant 0 : index
    %c0_11 = arith.constant 0 : index
    %25 = vector.load %arg6[%c0_10, %c0_11] : memref<1x32xf32, #tpu.memory_space<vmem>>, vector<1x32xf32>
    %26 = vector.broadcast %25 : vector<1x32xf32> to vector<64x32xf32>
    %27 = arith.addf %24, %26 : vector<64x32xf32>
    %cst_12 = arith.constant 0.000000e+00 : f32
    %28 = vector.broadcast %cst_12 : f32 to vector<64x32xf32>
    %29 = arith.maximumf %22, %28 : vector<64x32xf32>
    %30 = arith.addf %0, %29 : vector<64x32xf32>
    %cst_13 = arith.constant 0.000000e+00 : f32
    %31 = vector.broadcast %cst_13 : f32 to vector<64x32xf32>
    %32 = arith.maximumf %27, %31 : vector<64x32xf32>
    %33 = arith.addf %30, %32 : vector<64x32xf32>
    %c0_14 = arith.constant 0 : index
    %c0_15 = arith.constant 0 : index
    %34 = vector.load %arg7[%c0_14, %c0_15] : memref<32x128xf32, #tpu.memory_space<vmem>>, vector<32x128xf32>
    %cst_16 = arith.constant dense<0.000000e+00> : vector<64x128xf32>
    %35 = tpu.matmul %33, %34, %cst_16 {dimension_numbers = #tpu.dot_dimension_numbers<[1], [0], [0], [1], [0, 0, 1, 1], [], []>} : vector<64x32xf32>, vector<32x128xf32>, vector<64x128xf32> -> vector<64x128xf32>
    %c0_17 = arith.constant 0 : index
    %c0_18 = arith.constant 0 : index
    %36 = vector.load %arg8[%c0_17, %c0_18] : memref<1x128xf32, #tpu.memory_space<vmem>>, vector<1x128xf32>
    %37 = vector.broadcast %36 : vector<1x128xf32> to vector<64x128xf32>
    %38 = arith.addf %35, %37 : vector<64x128xf32>
    %cst_19 = arith.constant 0.000000e+00 : f32
    %39 = vector.broadcast %cst_19 : f32 to vector<64x96xf32>
    %40 = tpu.concatenate %33, %39 in 1 : vector<64x32xf32>, vector<64x96xf32> -> vector<64x128xf32>
    %c0_20 = arith.constant 0 : index
    %c0_21 = arith.constant 0 : index
    %41 = vector.load %arg9[%c0_20, %c0_21] : memref<64x128xf32, #tpu.memory_space<vmem>>, vector<64x128xf32>
    tpu.vector_store %arg9[%c0_20, %c0_21], %40 {strides = array<i32>} : memref<64x128xf32, #tpu.memory_space<vmem>>, vector<64x128xf32>,
    %c0_22 = arith.constant 0 : index
    %c0_23 = arith.constant 0 : index
    %42 = vector.load %arg10[%c0_22, %c0_23] : memref<64x128xf32, #tpu.memory_space<vmem>>, vector<64x128xf32>
    tpu.vector_store %arg10[%c0_22, %c0_23], %38 {strides = array<i32>} : memref<64x128xf32, #tpu.memory_space<vmem>>, vector<64x128xf32>,
    return
  }
  func.func @transform_0(%arg0: i32) -> (i32, i32) {
    %c0_i32 = arith.constant 0 : i32
    %c0_i32_0 = arith.constant 0 : i32
    return %arg0, %c0_i32 : i32, i32
  }
  func.func @transform_1(%arg0: i32) -> (i32, i32) {
    %c0_i32 = arith.constant 0 : i32
    %c0_i32_0 = arith.constant 0 : i32
    %c0_i32_1 = arith.constant 0 : i32
    return %c0_i32, %c0_i32_0 : i32, i32
  }
  func.func @transform_2(%arg0: i32) -> (i32, i32) {
    %c0_i32 = arith.constant 0 : i32
    %c0_i32_0 = arith.constant 0 : i32
    %c0_i32_1 = arith.constant 0 : i32
    return %c0_i32, %c0_i32_0 : i32, i32
  }
  func.func @transform_3(%arg0: i32) -> (i32, i32) {
    %c0_i32 = arith.constant 0 : i32
    %c0_i32_0 = arith.constant 0 : i32
    %c0_i32_1 = arith.constant 0 : i32
    return %c0_i32, %c0_i32_0 : i32, i32
  }
  func.func @transform_4(%arg0: i32) -> (i32, i32) {
    %c0_i32 = arith.constant 0 : i32
    %c0_i32_0 = arith.constant 0 : i32
    %c0_i32_1 = arith.constant 0 : i32
    return %c0_i32, %c0_i32_0 : i32, i32
  }
  func.func @transform_5(%arg0: i32) -> (i32, i32) {
    %c0_i32 = arith.constant 0 : i32
    %c0_i32_0 = arith.constant 0 : i32
    %c0_i32_1 = arith.constant 0 : i32
    return %c0_i32, %c0_i32_0 : i32, i32
  }
  func.func @transform_6(%arg0: i32) -> (i32, i32) {
    %c0_i32 = arith.constant 0 : i32
    %c0_i32_0 = arith.constant 0 : i32
    %c0_i32_1 = arith.constant 0 : i32
    return %c0_i32, %c0_i32_0 : i32, i32
  }
  func.func @transform_7(%arg0: i32) -> (i32, i32) {
    %c0_i32 = arith.constant 0 : i32
    %c0_i32_0 = arith.constant 0 : i32
    %c0_i32_1 = arith.constant 0 : i32
    return %c0_i32, %c0_i32_0 : i32, i32
  }
  func.func @transform_8(%arg0: i32) -> (i32, i32) {
    %c0_i32 = arith.constant 0 : i32
    %c0_i32_0 = arith.constant 0 : i32
    return %arg0, %c0_i32 : i32, i32
  }
  func.func @transform_9(%arg0: i32) -> (i32, i32) {
    %c0_i32 = arith.constant 0 : i32
    %c0_i32_0 = arith.constant 0 : i32
    return %arg0, %c0_i32 : i32, i32
  }
}

</mosaic_0001>

<bundles_post_ra>
// kernel: tpu_custom_call.1
= control target key start
LH: loop header
LB: loop body
LE: loop exit
PB: predicated region body
PF: predicated region fallthrough
CT: control target
= control target key end

     0   :  { %15 = vsyncpa [#allocation3], 0  ;;  %s994_s13 = smov 32   ;;  %vm57_vm0 = vcmask 261120   ;;  %s1339_s0 = inlined_call_operand.vmem [shape: f32[64,32], index: 0, kind: input, shape index: {}]   ;;  %s1340_s1 = inlined_call_operand.vmem [shape: f32[2,64], index: 1, kind: input, shape index: {}]   ;;  %s1341_s2 = inlined_call_operand.vmem [shape: f32[32,96], index: 2, kind: input, shape index: {}]   ;;  %s1342_s3 = inlined_call_operand.vmem [shape: f32[32,1], index: 3, kind: input, shape index: {}]   ;;  %s1343_s4 = inlined_call_operand.vmem [shape: f32[32,32], index: 4, kind: input, shape index: {}]   ;;  %s1344_s5 = inlined_call_operand.vmem [shape: f32[1,32], index: 5, kind: input, shape index: {}]   ;;  %s1345_s6 = inlined_call_operand.vmem [shape: f32[32,128], index: 6, kind: input, shape index: {}]   ;;  %s1346_s7 = inlined_call_operand.vmem [shape: f32[1,128], index: 7, kind: input, shape index: {}]   ;;  %s1347_s8 = inlined_call_operand.hbm [shape: f32[64,128], index: 8, kind: output, shape index: {0}]   ;;  %s1348_s9 = inlined_call_operand.hbm [shape: f32[64,128], index: 9, kind: output, shape index: {1}]  }
   0x1   :  { %v1059_v0 = vld [vmem:[%s1339_s0 + $0x30] sm:$0xff]  ;;  %v1064_v1 = vld [vmem:[%s1339_s0 + $0x20] sm:$0xff]  ;;  %v1076_v3 = vld [vmem:[%s1339_s0 + $0x38] sm:$0xff] }
   0x2   :  { %49 = vrot.lane.b32.xlu1 %v1059_v0, %s994_s13  ;;  %45 = vrot.lane.b32.xlu0 %v1064_v1, %s994_s13  ;;  %v1071_v2 = vld [vmem:[%s1339_s0 + $0x10] sm:$0xff]  ;;  %v1081_v4 = vld [vmem:[%s1339_s0 + $0x28] sm:$0xff] }
   0x3   :  { %809 = vmatprep.mubr.msk.f32.mxu1 %vm57_vm0, %v1071_v2 }
   0x4   :  { %16 = vsyncpa [#allocation5], 0  ;;  %v88_v5 = vlaneseq  ;;  %v1090_v6 = vld [vmem:[%s1339_s0] sm:$0xff]  ;;  %s995_s22 = smov 64   ;;  %v1098_v11 = vld [vmem:[%s1339_s0 + $0x8] sm:$0xff]  ;;  %vm63_vm1 = vcmask 1048064  }
   0x5   :  { %v62_v14 = vld [vmem:[%s1340_s1] sm:$0x3]  ;;  %v1110_v18 = vld [vmem:[%s1339_s0 + $0x18] sm:$0xff]  ;;  %s996_s1 = smov 1   ;;  %s997_s0 = smov 63   ;;  %v343_v59 = vld [vmem:[%s1343_s4 + $0x8] sm:$0xff] }
   0x6   :  { %51 = vrot.lane.b32.xlu1 %v1076_v3, %s994_s13  ;;  %47 = vrot.lane.b32.xlu0 %v1081_v4, %s994_s13  ;;  %v89_v7 = vshrl.u32 %v88_v5, 7  ;;  %s998_s29 = smov 62   ;;  %s999_s30 = smov 65   ;;  %v342_v58 = vld [vmem:[%s1343_s4] sm:$0xff]  ;;  %vm204_vm2 = vcmask 785408   ;;  %v344_v63 = vld [vmem:[%s1343_s4 + $0x10] sm:$0xff] }
   0x7   :  { %v1135_v60 = vpack.c.bf16 %v343_v59, %v342_v58  ;;  %v136_v61 = vld [vmem:[%s1341_s2] sm:$0xff]  ;;  %v345_v5 = vld [vmem:[%s1343_s4 + $0x18] sm:$0xff] }
   0x8   :  { %v102_v12 = vsub.s32 1, %v89_v7  ;;  %v90_v26 = vsub.s32 0, %v89_v7  ;;  %792 = vmatprep.mubr.msk.f32.mxu0 %vm204_vm2, %v136_v61  ;;  %v1149_v7 = vpack.c.bf16 %v345_v5, %v344_v63 }
   0x9   :  { %878 = vmatprep.subr.bf16.mxu1 %v1135_v60 }
   0xa   :  { %v103_v19 = vrot.slane %v62_v14, %v102_v12  ;;  %v91_v30 = vrot.slane %v62_v14, %v90_v26  ;;  %880 = vmatpush3.bf16.msra.mxu1 %v1135_v60 }
   0xb   :  { %879 = vmatprep.subr.bf16.mxu1 %v1149_v7 }
   0xe   :  { %881 = vmatpush3.bf16.msra.mxu1 %v1149_v7 }
  0x11   :  { %810 = vmatmul.mubr.msk.f32.vlgmr.msra.gmra.mrb[0].mxu1 %vm57_vm0, %v1110_v18 }
  0x12   :  { %812 = vmatprep.mubr.msk.f32.mxu1 %vm57_vm0, %v1064_v1 }
  0x15   :  { %813 = vmatmul.mubr.msk.f32.gmra.mrb[2].mxu1 %vm57_vm0, %v1081_v4 }
  0x16   :  { %815 = vmatprep.mubr.msk.f32.mxu1 %vm57_vm0, %v1059_v0 }
  0x19   :  { %816 = vmatmul.mubr.msk.f32.gmra.mrb[4].mxu1 %vm57_vm0, %v1076_v3 }
  0x74   :  { %v50_v8 = vpop.permute.xlu1 %49  ;;  %v46_v9 = vpop.permute.xlu0 %45 }
  0x75   :  { %v58_v10 = vsel %vm57_vm0, %v1090_v6, %v46_v9  ;;  %v60_v13 = vsel %vm57_vm0, %v1071_v2, %v50_v8 }
  0x76   :  { %64 = vrot.lane.b32.xlu0 %v58_v10, %s995_s22 }
  0x78   :  { %v48_v15 = vpop.permute.xlu0 %47  ;;  %v52_v17 = vpop.permute.xlu1 %51 }
  0x79   :  { %v59_v16 = vsel %vm57_vm0, %v1098_v11, %v48_v15  ;;  %v61_v20 = vsel %vm57_vm0, %v1110_v18, %v52_v17 }
  0x7a   :  { %67 = vrot.lane.b32.xlu1 %v59_v16, %s995_s22  ;;  %70 = vrot.lane.b32.xlu0 %v60_v13, %s995_s22  ;;  %v894_v31 = vpack.i.bf16 %v59_v16, %v58_v10  ;;  %v899_v32 = vpack.i.bf16 %v61_v20, %v60_v13 }
  0x7e   :  { %73 = vrot.lane.b32.xlu1 %v61_v20, %s995_s22  ;;  %105 = vrot.lane.b32.xlu0 %v103_v19, %s996_s1 }
  0xe8   :  { %v65_v21 = vpop.permute.xlu0 %64 }
  0xe9   :  { %v66_v22 = vsel %vm63_vm1, %v65_v21, %v58_v10  ;;  %v141_v21 = vld [vmem:[%s1342_s3 + $0x8] sm:$0xff] }
  0xea   :  { %76 = vrot.lane.b32.xlu0 %v66_v22, %s995_s22  ;;  %v140_v22 = vld [vmem:[%s1342_s3] sm:$0xff] }
  0xec   :  { %v68_v23 = vpop.permute.xlu1 %67  ;;  %v71_v25 = vpop.permute.xlu0 %70 }
  0xed   :  { %v69_v24 = vsel %vm63_vm1, %v68_v23, %v59_v16  ;;  %v72_v29 = vsel %vm63_vm1, %v71_v25, %v60_v13 }
  0xee   :  { %78 = vrot.lane.b32.xlu1 %v69_v24, %s995_s22  ;;  %v1000_v24 = vmov 0  }
  0xef   :  { %945 = vset.pattern.permute.xlu1 %v1000_v24  ;;  %944 = vset.pattern.permute.xlu0 %v1000_v24 }
  0xf0   :  { %v74_v27 = vpop.permute.xlu1 %73  ;;  %v106_v33 = vpop.permute.xlu0 %105 }
  0xf1   :  { %v75_v28 = vsel %vm63_vm1, %v74_v27, %v61_v20 }
  0xf2   :  { %82 = vrot.lane.b32.xlu0 %v75_v28, %s995_s22  ;;  %80 = vrot.lane.b32.xlu1 %v72_v29, %s995_s22  ;;  %v142_v28 = vld [vmem:[%s1342_s3 + $0x10] sm:$0xff]  ;;  %v143_v29 = vld [vmem:[%s1342_s3 + $0x18] sm:$0xff] }
  0xf6   :  { %895 = vrot.lane.b32.xlu0 %v894_v31, %s997_s0  ;;  %93 = vrot.lane.b32.xlu1 %v91_v30, %s997_s0 }
  0xfa   :  { %900 = vrot.lane.b32.xlu1 %v899_v32, %s997_s0 }
 0x15c   :  { %v77_v34 = vpop.permute.xlu0 %76 }
 0x15d   :  { %v84_v35 = vsel %vm63_vm1, %v77_v34, %v58_v10 }
 0x15e   :  { %v108_v38 = vmul.f32 %v106_v33, %v84_v35 }
 0x160   :  { %v79_v36 = vpop.permute.xlu1 %78 }
 0x161   :  { %v85_v37 = vsel %vm63_vm1, %v79_v36, %v59_v16 }
 0x162   :  { %v109_v39 = vmul.f32 %v106_v33, %v85_v37 }
 0x164   :  { %v81_v40 = vpop.permute.xlu1 %80  ;;  %v83_v41 = vpop.permute.xlu0 %82  ;;  %v904_v42 = vpack.i.bf16 %v109_v39, %v108_v38  ;;  %v137_v39 = vld [vmem:[%s1341_s2 + $0x8] sm:$0xff] }
 0x165   :  { %v86_v43 = vsel %vm63_vm1, %v81_v40, %v60_v13  ;;  %v87_v44 = vsel %vm63_vm1, %v83_v41, %v61_v20  ;;  %v138_v40 = vld [vmem:[%s1341_s2 + $0x10] sm:$0xff]  ;;  %v139_v41 = vld [vmem:[%s1341_s2 + $0x18] sm:$0xff] }
 0x166   :  { %v110_v45 = vmul.f32 %v106_v33, %v86_v43  ;;  %v111_v46 = vmul.f32 %v106_v33, %v87_v44  ;;  %905 = vrot.lane.b32.xlu0 %v904_v42, %s998_s29  ;;  %v811_v42 = vpop.f32.mrb[0].mxu1 }
 0x168   :  { %v94_v47 = vpop.permute.xlu1 %93  ;;  %v896_v48 = vpop.permute.xlu0 %895  ;;  %v909_v49 = vpack.i.bf16 %v111_v46, %v110_v45 }
 0x169   :  { %v96_v50 = vmul.f32 %v94_v47, %v84_v35  ;;  %v97_v51 = vmul.f32 %v94_v47, %v85_v37  ;;  %v98_v52 = vmul.f32 %v94_v47, %v86_v43  ;;  %v99_v53 = vmul.f32 %v94_v47, %v87_v44  ;;  %v510_v43 = vld [vmem:[%s1345_s6] sm:$0xff]  ;;  %v511_v44 = vld [vmem:[%s1345_s6 + $0x8] sm:$0xff]  ;;  %v449_v45 = vpop.f32.mrb[1].mxu1  ;;  %v512_v47 = vld [vmem:[%s1345_s6 + $0x10] sm:$0xff] }
 0x16a   :  { %910 = vrot.lane.b32.xlu1 %v909_v49, %s998_s29  ;;  %v870_v46 = vpack.c.bf16 %v511_v44, %v510_v43 }
 0x16b   :  { %v914_v54 = vpack.i.bf16 %v97_v51, %v96_v50  ;;  %v919_v55 = vpack.i.bf16 %v99_v53, %v98_v52  ;;  %v1207_v50 = vpop.f32.mrb[2].mxu1 }
 0x16c   :  { %v901_v56 = vpop.permute.xlu1 %900  ;;  %871 = vmatprep.subr.bf16.mxu1 %v870_v46  ;;  %v1209_v51 = vpop.f32.mrb[3].mxu1 }
 0x16d   :  { %915 = vrot.lane.b32.xlu0 %v914_v54, %s999_s30  ;;  %873 = vmatpush3.bf16.msra.mxu1 %v870_v46  ;;  %v1211_v53 = vpop.f32.mrb[4].mxu1 }
 0x16e   :  { %920 = vrot.lane.b32.xlu1 %v919_v55, %s999_s30  ;;  %v1213_v55 = vpop.f32.mrb[5].mxu1 }
 0x171   :  { %925 = vrot.lane.b32.xlu0 %v896_v48, %s999_s30  ;;  %v513_v48 = vld [vmem:[%s1345_s6 + $0x18] sm:$0xff] }
 0x172   :  { %930 = vrot.lane.b32.xlu1 %v901_v56, %s999_s30  ;;  %v874_v49 = vpack.c.bf16 %v513_v48, %v512_v47 }
 0x174   :  { %875 = vmatprep.subr.bf16.mxu1 %v874_v49 }
 0x175   :  { %877 = vmatpush3.bf16.msra.mxu1 %v874_v49 }
 0x1d8   :  { %v906_v57 = vpop.permute.xlu0 %905 }
 0x1d9   :  { %935 = vrot.lane.b32.xlu0 %v906_v57, %s999_s30  ;;  %v1218_v57 = vld [vmem:[%s1344_s5] ss:$0 sm:$0xff] }
 0x1da   :  { %v455_v61 = vadd.f32 %v811_v42, %v1218_v57  ;;  %v450_v5 = vadd.f32 %v1218_v57, %v449_v45 }
 0x1dc   :  { %v911_v62 = vpop.permute.xlu1 %910 }
 0x1dd   :  { %940 = vrot.lane.b32.xlu1 %v911_v62, %s999_s30  ;;  %146 = vperm.xlu0 %944, %v140_v22  }
 0x1df   :  { %v916_v8 = vpop.permute.xlu0 %915 }
 0x1e0   :  { %v918_v9 = vunpack.i.h.bf16 %v916_v8  ;;  %v917_v10 = vunpack.i.l.bf16 %v916_v8  ;;  %v921_v12 = vpop.permute.xlu1 %920 }
 0x1e1   :  { %v923_v13 = vunpack.i.h.bf16 %v921_v12  ;;  %v922_v14 = vunpack.i.l.bf16 %v921_v12  ;;  %151 = vperm.xlu1 %945, %v141_v21   ;;  %161 = vperm.xlu0 %944, %v143_v29  }
 0x1e2   :  { %v838_v15 = vpack.c.bf16 %v918_v9, %v917_v10 }
 0x1e3   :  { %v842_v16 = vpack.c.bf16 %v923_v13, %v922_v14  ;;  %v926_v17 = vpop.permute.xlu0 %925  ;;  %v497_v13 = vmax.f32 %v455_v61, 0.0 }
 0x1e4   :  { %v928_v19 = vunpack.i.h.bf16 %v926_v17  ;;  %v927_v20 = vunpack.i.l.bf16 %v926_v17  ;;  %839 = vmatprep.subr.bf16.mxu0 %v838_v15  ;;  %v931_v23 = vpop.permute.xlu1 %930 }
 0x1e5   :  { %841 = vmatpush3.bf16.msra.mxu0 %v838_v15  ;;  %v933_v26 = vunpack.i.h.bf16 %v931_v23  ;;  %v932_v27 = vunpack.i.l.bf16 %v931_v23  ;;  %156 = vperm.xlu1 %945, %v142_v28  }
 0x1e6   :  { %843 = vmatprep.subr.bf16.mxu0 %v842_v16  ;;  %v846_v25 = vpack.c.bf16 %v928_v19, %v927_v20 }
 0x1e7   :  { %v850_v30 = vpack.c.bf16 %v933_v26, %v932_v27 }
 0x1e9   :  { %845 = vmatpush3.bf16.msra.mxu0 %v842_v16  ;;  %v496_v16 = vmax.f32 %v450_v5, 0.0 }
 0x1ea   :  { %847 = vmatprep.subr.bf16.mxu0 %v846_v25 }
 0x1ed   :  { %849 = vmatpush3.bf16.msra.mxu0 %v846_v25 }
 0x1ee   :  { %851 = vmatprep.subr.bf16.mxu0 %v850_v30 }
 0x1f1   :  { %853 = vmatpush3.bf16.msra.mxu0 %v850_v30 }
 0x24b   :  { %v936_v31 = vpop.permute.xlu0 %935 }
 0x24c   :  { %v938_v32 = vunpack.i.h.bf16 %v936_v31  ;;  %v937_v33 = vunpack.i.l.bf16 %v936_v31 }
 0x24e   :  { %v854_v34 = vpack.c.bf16 %v938_v32, %v937_v33 }
 0x24f   :  { %v941_v35 = vpop.permute.xlu1 %940 }
 0x250   :  { %v943_v36 = vunpack.i.h.bf16 %v941_v35  ;;  %v942_v37 = vunpack.i.l.bf16 %v941_v35  ;;  %855 = vmatprep.subr.bf16.mxu0 %v854_v34 }
 0x251   :  { %857 = vmatpush3.bf16.msra.mxu0 %v854_v34 }
 0x252   :  { %v858_v38 = vpack.c.bf16 %v943_v36, %v942_v37 }
 0x254   :  { %859 = vmatprep.subr.bf16.mxu0 %v858_v38 }
 0x255   :  { %861 = vmatpush3.bf16.msra.mxu0 %v858_v38 }
 0x256   :  { %863 = vmatprep.subr.bf16.mxu0 %v1135_v60 }
 0x258   :  { %793 = vmatmul.mubr.msk.f32.vlgmr.msra.gmra.mrb[0].mxu0 %vm204_vm2, %v137_v39 }
 0x259   :  { %865 = vmatpush3.bf16.msra.mxu0 %v1135_v60  ;;  %795 = vmatprep.mubr.msk.f32.mxu0 %vm204_vm2, %v138_v40 }
 0x25a   :  { %867 = vmatprep.subr.bf16.mxu0 %v1149_v7 }
 0x25c   :  { %796 = vmatmul.mubr.msk.f32.gmra.mrb[2].mxu0 %vm204_vm2, %v139_v41  ;;  %v147_v52 = vpop.permute.xlu0 %146  ;;  %v1271_v41 = vld [vmem:[%s1346_s7] ss:$0 sm:$0xff]  ;;  %s1001_s7 = smov 96  }
 0x25d   :  { %869 = vmatpush3.bf16.msra.mxu0 %v1149_v7  ;;  %806 = vmatprep.mubr.msk.f32.mxu0 %vm57_vm0, %v1090_v6 }
 0x260   :  { %807 = vmatmul.mubr.msk.f32.vlgmr.msra.gmra.mrb[4].mxu0 %vm57_vm0, %v1098_v11  ;;  %v152_v54 = vpop.permute.xlu1 %151  ;;  %v162_v62 = vpop.permute.xlu0 %161 }
 0x264   :  { %v157_v7 = vpop.permute.xlu1 %156 }
 0x32b   :  { %v794_v56 = vpop.f32.mrb[0].mxu0 }
 0x32c   :  { %v1220_v58 = vadd.f32 %v794_v56, %v152_v54  ;;  %v283_v59 = vpop.f32.mrb[1].mxu0 }
 0x32d   :  { %v1222_v60 = vadd.f32 %v283_v59, %v147_v52 }
 0x32e   :  { %305 = vrot.lane.b32.xlu0 %v1220_v58, %s995_s22  ;;  %v479_v14 = vmax.f32 %v1220_v58, 0.0 }
 0x32f   :  { %v797_v63 = vpop.f32.mrb[2].mxu0  ;;  %302 = vrot.lane.b32.xlu1 %v1222_v60, %s995_s22  ;;  %v478_v19 = vmax.f32 %v1222_v60, 0.0 }
 0x330   :  { %v1230_v8 = vadd.f32 %v797_v63, %v162_v62  ;;  %v293_v9 = vpop.f32.mrb[3].mxu0  ;;  %v487_v26 = vadd.f32 %v479_v14, %v1098_v11 }
 0x331   :  { %v1232_v10 = vadd.f32 %v293_v9, %v157_v7  ;;  %v486_v29 = vadd.f32 %v478_v19, %v1090_v6  ;;  %v460_v7 = vadd.f32 %v1218_v57, %v1209_v51 }
 0x332   :  { %v481_v12 = vmax.f32 %v1230_v8, 0.0  ;;  %311 = vrot.lane.b32.xlu0 %v1230_v8, %s995_s22 }
 0x333   :  { %v480_v15 = vmax.f32 %v1232_v10, 0.0  ;;  %v808_v17 = vpop.f32.mrb[4].mxu0  ;;  %308 = vrot.lane.b32.xlu1 %v1232_v10, %s995_s22 }
 0x334   :  { %v489_v20 = vadd.f32 %v481_v12, %v1110_v18  ;;  %v445_v21 = vadd.f32 %v808_v17, %v1218_v57  ;;  %v439_v22 = vpop.f32.mrb[5].mxu0  ;;  %v475_v12 = vadd.f32 %v1211_v53, %v1218_v57 }
 0x335   :  { %v488_v23 = vadd.f32 %v480_v15, %v1071_v2  ;;  %v440_v24 = vadd.f32 %v1218_v57, %v439_v22  ;;  %v498_v15 = vmax.f32 %v460_v7, 0.0 }
 0x336   :  { %v505_v25 = vadd.f32 %v497_v13, %v489_v20  ;;  %v495_v27 = vmax.f32 %v445_v21, 0.0  ;;  %v501_v19 = vmax.f32 %v475_v12, 0.0 }
 0x337   :  { %v504_v28 = vadd.f32 %v496_v16, %v488_v23  ;;  %v494_v30 = vmax.f32 %v440_v24, 0.0 }
 0x338   :  { %v653_v31 = vsel %vm57_vm0, %v505_v25, 0.0  ;;  %v503_v32 = vadd.f32 %v495_v27, %v487_v26 }
 0x339   :  { %661 = vst [vmem:[#allocation2 + $0x18] sm:$0xff] %v653_v31  ;;  %v652_v18 = vsel %vm57_vm0, %v504_v28, 0.0  ;;  %v502_v33 = vadd.f32 %v494_v30, %v486_v29 }
 0x33a   :  { %660 = vst [vmem:[#allocation2 + $0x10] sm:$0xff] %v652_v18  ;;  %v651_v2 = vsel %vm57_vm0, %v503_v32, 0.0 }
 0x33b   :  { %659 = vst [vmem:[#allocation2 + $0x8] sm:$0xff] %v651_v2  ;;  %v650_v34 = vsel %vm57_vm0, %v502_v33, 0.0  ;;  %826 = vmatprep.mubr.msk.f32.mxu1 %vm57_vm0, %v502_v33 }
 0x33c   :  { %658 = vst [vmem:[#allocation2] sm:$0xff] %v650_v34  ;;  %827 = vmatmul.mubr.msk.f32.vlgmr.msra.gmra.mrb[6].mxu1 %vm57_vm0, %v503_v32 }
 0x33d   :  { %829 = vmatprep.mubr.msk.f32.mxu1 %vm57_vm0, %v504_v28 }
 0x340   :  { %830 = vmatmul.mubr.msk.f32.gmra.mrb[8].mxu1 %vm57_vm0, %v505_v25 }
 0x3a0   :  { %v306_v6 = vpop.permute.xlu0 %305 }
 0x3a1   :  { %v303_v11 = vpop.permute.xlu1 %302  ;;  %v307_v35 = vsel %vm63_vm1, %v306_v6, %v1220_v58 }
 0x3a2   :  { %316 = vrot.lane.b32.xlu0 %v307_v35, %s995_s22  ;;  %v304_v36 = vsel %vm63_vm1, %v303_v11, %v1222_v60 }
 0x3a3   :  { %314 = vrot.lane.b32.xlu1 %v304_v36, %s995_s22 }
 0x3a4   :  { %v312_v37 = vpop.permute.xlu0 %311 }
 0x3a5   :  { %v309_v38 = vpop.permute.xlu1 %308  ;;  %v313_v39 = vsel %vm63_vm1, %v312_v37, %v1230_v8 }
 0x3a6   :  { %320 = vrot.lane.b32.xlu0 %v313_v39, %s995_s22  ;;  %v310_v40 = vsel %vm63_vm1, %v309_v38, %v1232_v10 }
 0x3a7   :  { %318 = vrot.lane.b32.xlu1 %v310_v40, %s995_s22  ;;  %s1002_s22 = smov [#allocation2]  }
 0x3a8   :  { %s679_s19 = sshll.u32 %s1002_s22, 4  ;;  %s680_s19 = int_to_ptr.vmem [resolvable:$true] %s679_s19 }
 0x3a9   :  { %s946_s4 = scalar_lea.vmem %s680_s19, 1024  ;;  %p951_p1 = scmp.lt.s32.totalorder %s680_s19, %s680_s19 }
 0x3aa   :  { %p947_p0 = scmp.ne.s32.totalorder %s680_s19, %s946_s4  ;;  %p952_p2 = scmp.lt.s32.totalorder %s946_s4, %s946_s4 }
 0x3ac   :  { %p953_p3 = por %p952_p2, %p951_p1 }
 0x3ae   :  { %p954_p4 = pnand %p953_p3, %p947_p0 }
 0x40f   :  { %v828_v42 = vpop.f32.mrb[6].mxu1 }
 0x410   :  { %v617_v43 = vadd.f32 %v828_v42, %v1271_v41  ;;  %v611_v44 = vpop.f32.mrb[7].mxu1 }
 0x411   :  { %v612_v45 = vadd.f32 %v1271_v41, %v611_v44 }
 0x412   :  { %667 = vst [vmem:[#allocation4 + $0x8] sm:$0xff] %v617_v43 }
 0x413   :  { %666 = vst [vmem:[#allocation4] sm:$0xff] %v612_v45  ;;  %v831_v46 = vpop.f32.mrb[8].mxu1 }
 0x414   :  { %v627_v47 = vadd.f32 %v831_v46, %v1271_v41  ;;  %v317_v48 = vpop.permute.xlu0 %316  ;;  %v621_v49 = vpop.f32.mrb[9].mxu1 }
 0x415   :  { %v622_v52 = vadd.f32 %v1271_v41, %v621_v49  ;;  %v315_v54 = vpop.permute.xlu1 %314  ;;  %v323_v56 = vsel %vm63_vm1, %v317_v48, %v1220_v58  ;;  %v465_v58 = vadd.f32 %v1207_v50, %v1218_v57 }
 0x416   :  { %669 = vst [vmem:[#allocation4 + $0x18] sm:$0xff] %v627_v47  ;;  %332 = vrot.lane.b32.xlu0 %v323_v56, %s1001_s7  ;;  %v322_v59 = vsel %vm63_vm1, %v315_v54, %v1222_v60 }
 0x417   :  { %668 = vst [vmem:[#allocation4 + $0x10] sm:$0xff] %v622_v52  ;;  %330 = vrot.lane.b32.xlu1 %v322_v59, %s1001_s7  ;;  %v499_v60 = vmax.f32 %v465_v58, 0.0 }
 0x418   :  { %v321_v61 = vpop.permute.xlu0 %320 }
 0x419   :  { %v319_v62 = vpop.permute.xlu1 %318  ;;  %v325_v63 = vsel %vm63_vm1, %v321_v61, %v1230_v8  ;;  %v470_v8 = vadd.f32 %v1218_v57, %v1213_v55 }
 0x41a   :  { %336 = vrot.lane.b32.xlu0 %v325_v63, %s1001_s7  ;;  %v324_v5 = vsel %vm63_vm1, %v319_v62, %v1232_v10 }
 0x41b   :  { %334 = vrot.lane.b32.xlu1 %v324_v5, %s1001_s7  ;;  %v500_v22 = vmax.f32 %v470_v8, 0.0 }
 0x488   :  { %v333_v9 = vpop.permute.xlu0 %332 }
 0x489   :  { %v483_v13 = vmax.f32 %v333_v9, 0.0  ;;  %v331_v14 = vpop.permute.xlu1 %330 }
 0x48a   :  { %v482_v16 = vmax.f32 %v331_v14, 0.0 }
 0x48b   :  { %v491_v10 = vadd.f32 %v483_v13, %v1081_v4 }
 0x48c   :  { %v490_v17 = vadd.f32 %v482_v16, %v1064_v1  ;;  %v337_v50 = vpop.permute.xlu0 %336 }
 0x48d   :  { %v507_v20 = vadd.f32 %v499_v60, %v491_v10  ;;  %v485_v51 = vmax.f32 %v337_v50, 0.0  ;;  %v335_v21 = vpop.permute.xlu1 %334 }
 0x48e   :  { %v506_v23 = vadd.f32 %v498_v15, %v490_v17  ;;  %v484_v24 = vmax.f32 %v335_v21, 0.0 }
 0x48f   :  { %v655_v53 = vsel %vm57_vm0, %v507_v20, 0.0  ;;  %v493_v25 = vadd.f32 %v485_v51, %v1076_v3 }
 0x490   :  { %663 = vst [vmem:[#allocation2 + $0x28] sm:$0xff] %v655_v53  ;;  %v654_v55 = vsel %vm57_vm0, %v506_v23, 0.0  ;;  %v492_v57 = vadd.f32 %v484_v24, %v1059_v0  ;;  %832 = vmatprep.mubr.msk.f32.mxu1 %vm57_vm0, %v506_v23 }
 0x491   :  { %662 = vst [vmem:[#allocation2 + $0x20] sm:$0xff] %v654_v55  ;;  %v509_v1 = vadd.f32 %v501_v19, %v493_v25  ;;  %833 = vmatmul.mubr.msk.f32.gmra.mrb[10].mxu1 %vm57_vm0, %v507_v20 }
 0x492   :  { %v508_v4 = vadd.f32 %v500_v22, %v492_v57 }
 0x493   :  { %v657_v26 = vsel %vm57_vm0, %v509_v1, 0.0 }
 0x494   :  { %665 = vst [vmem:[#allocation2 + $0x38] sm:$0xff] %v657_v26  ;;  %v656_v27 = vsel %vm57_vm0, %v508_v4, 0.0  ;;  %835 = vmatprep.mubr.msk.f32.mxu1 %vm57_vm0, %v508_v4 }
 0x495   :  { %664 = vst [vmem:[#allocation2 + $0x30] sm:$0xff] %v656_v27  ;;  %836 = vmatmul.mubr.msk.f32.gmra.mrb[12].mxu1 %vm57_vm0, %v509_v1 }
 0x496   :  { %957 = shalt.err (!%p954_p4)
}
 0x497   :  { %s958_s23 = scalar_lea.hbm %s1347_s8, 1024 }
 0x498   :  { %p959_p5 = scmp.ne.s32.totalorder %s1347_s8, %s958_s23  ;;  %p962_p6 = scmp.lt.u32.totalorder %s958_s23, %s1347_s8 }
 0x49a   :  { %p964_p7 = pnand %p962_p6, %p959_p5 }
 0x49c   :  { %967 = shalt.err (!%p964_p7)
}
 0x49d   :  { %s1003_s3 = smov 128   ;;  %s1004_s28 = smov 8  }
 0x49e   :  { %685 = dma.vmem_to_hbm [thread:$0]  %s680_s19, 1024, %s1347_s8, [#allocation3], %s1003_s3, %s1003_s3, %s1004_s28  }
 0x49f   :  { %s1005_s29 = smov [#allocation4]  }
 0x4a0   :  { %s691_s30 = sshll.u32 %s1005_s29, 4  ;;  %s692_s30 = int_to_ptr.vmem [resolvable:$true] %s691_s30 }
 0x4a1   :  { %s968_s8 = scalar_lea.vmem %s692_s30, 1024  ;;  %p973_p9 = scmp.lt.s32.totalorder %s692_s30, %s692_s30 }
 0x4a2   :  { %p969_p8 = scmp.ne.s32.totalorder %s692_s30, %s968_s8  ;;  %p974_p10 = scmp.lt.s32.totalorder %s968_s8, %s968_s8 }
 0x4a4   :  { %p975_p11 = por %p974_p10, %p973_p9 }
 0x4a6   :  { %p976_p12 = pnand %p975_p11, %p969_p8 }
 0x564   :  { %v834_v0 = vpop.f32.mrb[10].mxu1 }
 0x565   :  { %v637_v3 = vadd.f32 %v834_v0, %v1271_v41  ;;  %v631_v28 = vpop.f32.mrb[11].mxu1 }
 0x566   :  { %v632_v29 = vadd.f32 %v1271_v41, %v631_v28 }
 0x567   :  { %671 = vst [vmem:[#allocation4 + $0x28] sm:$0xff] %v637_v3 }
 0x568   :  { %670 = vst [vmem:[#allocation4 + $0x20] sm:$0xff] %v632_v29  ;;  %v837_v30 = vpop.f32.mrb[12].mxu1 }
 0x569   :  { %v647_v31 = vadd.f32 %v837_v30, %v1271_v41  ;;  %v641_v32 = vpop.f32.mrb[13].mxu1 }
 0x56a   :  { %v642_v18 = vadd.f32 %v1271_v41, %v641_v32 }
 0x56b   :  { %673 = vst [vmem:[#allocation4 + $0x38] sm:$0xff] %v647_v31 }
 0x56c   :  { %672 = vst [vmem:[#allocation4 + $0x30] sm:$0xff] %v642_v18 }
 0x56d   :  { %979 = shalt.err (!%p976_p12)
}
 0x56e   :  { %s980_s12 = scalar_lea.hbm %s1348_s9, 1024 }
 0x56f   :  { %p981_p13 = scmp.ne.s32.totalorder %s1348_s9, %s980_s12  ;;  %p984_p0 = scmp.lt.u32.totalorder %s980_s12, %s1348_s9 }
 0x571   :  { %p986_p1 = pnand %p984_p0, %p981_p13 }
 0x573   :  { %989 = shalt.err (!%p986_p1)
}
 0x574   :  { %697 = dma.vmem_to_hbm [thread:$0]  %s692_s30, 1024, %s1348_s9, [#allocation5], %s1003_s3, %s1003_s3, %s1004_s28  }
 0x575   :  { %990 = dma.done.wait [#allocation3], 1024  }
 0x576   :  { %991 = vsyncadd [#allocation3], 4294966272 }
 0x577   :  { %992 = dma.done.wait [#allocation5], 1024  }
 0x578   :  { %993 = vsyncadd [#allocation5], 4294966272 }
 0x579   :  { %704 = vsyncpa [#allocation3], 1 }
 0x57a   :  { %705 = vsyncpa [#allocation5], 1 }

</bundles_post_ra>
